<compile_context>
chip_gen: v7x
topology: tpu7x:2x2x1
jax: 0.10.0
libtpu: 0.0.40
codegen_flags: <defaults>
</compile_context>

<pallas_src>
import jax
import jax.numpy as jnp
import numpy as np
from jax.experimental import pallas as pl
from jax.experimental.pallas import tpu as pltpu


# ----------------------------- kernel ---------------------------------------
def _upconv2x2_kernel(x_ref, w_ref, b_ref, o_ref):
    """One row-tile of ConvTranspose2d(k=2, s=2) as a single MXU matmul.

    x_ref : (TM, Cin)       row tile of the flattened NHWC input (bf16/f32)
    w_ref : (Cin, 4*Cout)   weight, taps packed lane-major as (kh, kw, co)
    b_ref : (1, 4*Cout)     f32 bias replicated over the 4 taps
    o_ref : (TM, 4*Cout)    f32 per-pixel 2x2 output patch, packed (kh, kw, co)
    """
    y = jnp.dot(x_ref[...], w_ref[...], preferred_element_type=jnp.float32)
    o_ref[...] = (y + b_ref[...]).astype(o_ref.dtype)


# ----------------------------- tiling helper --------------------------------
def _pick_row_tile(rows, cin, cout, row_tile, in_bytes):
    """Row tile: multiple of 16 (bf16 sublane packing), >=2 grid steps when the
    problem allows (v7x megacore), double-buffered footprint <= ~40 MiB so the
    same tiling fits v7x's 64 MiB VMEM as well as v5e/v6e's 128 MiB."""
    tm = min(row_tile, rows)
    if rows >= 32:
        tm = min(tm, -(-rows // 2))          # at least two grid steps
        tm = max(16, (tm // 16) * 16)
    else:
        tm = rows                            # block == full dim is always legal

    def footprint(t):                        # double-buffered VMEM bytes
        return 2 * (t * cin * in_bytes + t * 4 * cout * 4
                    + cin * 4 * cout * in_bytes + 4 * cout * 4)

    budget = 40 * 1024 * 1024
    while tm > 16 and footprint(tm) > budget:
        tm = max(16, ((tm // 2) // 16) * 16)
    return tm


# ----------------------------- pallas_call wrapper ---------------------------
def _upconv_matmul(x2d, w2d, b2d, rows, cin, cout, row_tile):
    in_bytes = jnp.dtype(x2d.dtype).itemsize
    tm = _pick_row_tile(rows, cin, cout, row_tile, in_bytes)
    grid = (pl.cdiv(rows, tm),)

    return pl.pallas_call(
        _upconv2x2_kernel,
        out_shape=jax.ShapeDtypeStruct((rows, 4 * cout), jnp.float32),
        grid=grid,
        in_specs=[
            pl.BlockSpec((tm, cin), lambda i: (i, 0)),          # row tile
            pl.BlockSpec((cin, 4 * cout), lambda i: (0, 0)),    # full weight
            pl.BlockSpec((1, 4 * cout), lambda i: (0, 0)),      # full bias
        ],
        out_specs=pl.BlockSpec((tm, 4 * cout), lambda i: (i, 0)),
        compiler_params=pltpu.CompilerParams(
            dimension_semantics=("parallel",),                  # megacore on v7x
            vmem_limit_bytes=48 * 1024 * 1024),
        cost_estimate=pl.CostEstimate(
            flops=2 * rows * cin * 4 * cout,
            transcendentals=0,
            bytes_accessed=(rows * cin * in_bytes + cin * 4 * cout * in_bytes
                            + 4 * cout * 4 + rows * 4 * cout * 4)),
    )(x2d, w2d, b2d)


def _pack_params(weight, bias, cin, cout, compute_dtype):
    # (Cin, Cout, kh, kw) -> (Cin, kh, kw, Cout) -> (Cin, 4*Cout): all four taps
    # fused into one MXU matmul (contraction Cin, output 4*Cout).
    w2d = jnp.transpose(weight, (0, 2, 3, 1)).reshape(cin, 4 * cout)
    w2d = w2d.astype(compute_dtype)
    b2d = jnp.tile(bias.astype(jnp.float32), 4).reshape(1, 4 * cout)
    return w2d, b2d


# ----------------------------- public entry points ---------------------------
def up_block2(x_nchw, weight, bias, *, row_tile=512, compute_dtype=jnp.bfloat16):
    """UpBlock2.forward: ConvTranspose2d(Cin, Cout, kernel_size=2, stride=2).

    x_nchw : (N, Cin, H, W)      (PyTorch NCHW)
    weight : (Cin, Cout, 2, 2)   (PyTorch ConvTranspose2d layout)
    bias   : (Cout,)
    returns (N, Cout, 2H, 2W) float32
    """
    N, Cin, H, W = x_nchw.shape
    cin_w, Cout, KH, KW = weight.shape
    assert cin_w == Cin and (KH, KW) == (2, 2)
    rows = N * H * W

    # Input-side plumbing: NCHW -> flat NHWC rows (channels on lanes); the bf16
    # cast fuses into this single copy.  (Not expressible as a rectangular
    # BlockSpec from NCHW, so it stays wrapper-side — paid exactly once.)
    x2d = jnp.transpose(x_nchw, (0, 2, 3, 1)).reshape(rows, Cin).astype(compute_dtype)
    w2d, b2d = _pack_params(weight, bias, Cin, Cout, compute_dtype)

    y2d = _upconv_matmul(x2d, w2d, b2d, rows, Cin, Cout, row_tile)

    # Output-side plumbing: ONE fused permutation doing tap interleave + NCHW
    # conversion in a single pass over Y:
    #   (n, h, w, kh, kw, co) -> (n, co, h, kh, w, kw) -> (N, Cout, 2H, 2W)
    y6 = y2d.reshape(N, H, W, 2, 2, Cout)
    return jnp.transpose(y6, (0, 5, 1, 3, 2, 4)).reshape(N, Cout, 2 * H, 2 * W)


def up_block2_nhwc(x_nhwc, weight, bias, *, row_tile=512, compute_dtype=jnp.bfloat16):
    """Same op for NHWC-end-to-end models: no input transpose at all; only the
    tap-interleave pass remains on the output side."""
    N, H, W, Cin = x_nhwc.shape
    cin_w, Cout, KH, KW = weight.shape
    assert cin_w == Cin and (KH, KW) == (2, 2)
    rows = N * H * W

    x2d = x_nhwc.reshape(rows, Cin).astype(compute_dtype)   # leading-dim collapse only
    w2d, b2d = _pack_params(weight, bias, Cin, Cout, compute_dtype)
    y2d = _upconv_matmul(x2d, w2d, b2d, rows, Cin, Cout, row_tile)

    y6 = y2d.reshape(N, H, W, 2, 2, Cout)
    return jnp.transpose(y6, (0, 1, 3, 2, 4, 5)).reshape(N, 2 * H, 2 * W, Cout)


# ---------------- pure-JAX reference (independent correctness check) --------
def _ref_upblock2(x_nchw, weight, bias):
    """ConvTranspose2d(k=2, s=2) via the standard dilated-conv equivalence."""
    x = jnp.transpose(x_nchw, (0, 2, 3, 1))                    # NHWC
    w_flip = weight[:, :, ::-1, ::-1]                          # flip spatial
    w_hwio = jnp.transpose(w_flip, (2, 3, 0, 1))               # (2,2,Cin,Cout)
    y = jax.lax.conv_general_dilated(
        x, w_hwio, window_strides=(1, 1),
        padding=((1, 1), (1, 1)), lhs_dilation=(2, 2),
        dimension_numbers=("NHWC", "HWIO", "NHWC"),
        precision=jax.lax.Precision.HIGHEST)
    y = y + bias
    return jnp.transpose(y, (0, 3, 1, 2))                      # NCHW


if __name__ == "__main__":
    # Cout=32 keeps the kernel's output lane dim at 4*Cout=128 (dense stores,
    # matters most on v5e's single store slot).
    N, Cin, Cout, H, W = 2, 4, 32, 16, 16

    key = jax.random.PRNGKey(0)
    kx, kw, kb = jax.random.split(key, 3)
    x = jax.random.normal(kx, (N, Cin, H, W), dtype=jnp.float32)
    weight = 0.1 * jax.random.normal(kw, (Cin, Cout, 2, 2), dtype=jnp.float32)
    bias = 0.1 * jax.random.normal(kb, (Cout,), dtype=jnp.float32)

    ref = jax.block_until_ready(_ref_upblock2(x, weight, bias))

    # Exact path (f32 matmul inputs): tight check of kernel + layout plumbing.
    out_f32 = jax.block_until_ready(
        up_block2(x, weight, bias, compute_dtype=jnp.float32))
    assert out_f32.shape == (N, Cout, 2 * H, 2 * W), out_f32.shape
    np.testing.assert_allclose(np.asarray(out_f32), np.asarray(ref),
                               rtol=1e-4, atol=1e-4)

    # Default production path (bf16 inputs, f32 accumulation).  rows=512 with
    # row_tile=512 -> tile 256, grid=(2,): multi-step pipelined "parallel" grid.
    out = jax.block_until_ready(up_block2(x, weight, bias))
    np.testing.assert_allclose(np.asarray(out), np.asarray(ref),
                               rtol=2e-2, atol=2e-2)

    # NHWC fast path (skips the input transpose entirely).
    x_nhwc = jnp.transpose(x, (0, 2, 3, 1))
    out_nhwc = jax.block_until_ready(up_block2_nhwc(x_nhwc, weight, bias))
    np.testing.assert_allclose(
        np.asarray(jnp.transpose(out_nhwc, (0, 3, 1, 2))), np.asarray(ref),
        rtol=2e-2, atol=2e-2)

    print("KERNEL_OK")
</pallas_src>

<mosaic_0001>
module attributes {stable_mosaic.version = 11 : i64} {
  func.func @_upconv2x2_kernel(%arg0: i32, %arg1: memref<256x4xf32, #tpu.memory_space<vmem>>, %arg2: memref<4x128xf32, #tpu.memory_space<vmem>>, %arg3: memref<1x128xf32, #tpu.memory_space<vmem>>, %arg4: memref<256x128xf32, #tpu.memory_space<vmem>>) attributes {dimension_semantics = [#tpu.dimension_semantics<parallel>], iteration_bounds = array<i64: 2>, scalar_prefetch = 0 : i64, scratch_operands = 0 : i64, tpu.core_type = #tpu.core_type<tc>, window_params = [{transform_indices = @transform_0, window_bounds = array<i64: 256, 4>}, {pipeline_mode = #tpu.pipeline_mode<synchronous>, transform_indices = @transform_1, window_bounds = array<i64: 4, 128>}, {pipeline_mode = #tpu.pipeline_mode<synchronous>, transform_indices = @transform_2, window_bounds = array<i64: 1, 128>}, {transform_indices = @transform_3, window_bounds = array<i64: 256, 128>}]} {
    %c0 = arith.constant 0 : index
    %c0_0 = arith.constant 0 : index
    %0 = vector.load %arg1[%c0, %c0_0] : memref<256x4xf32, #tpu.memory_space<vmem>>, vector<256x4xf32>
    %c0_1 = arith.constant 0 : index
    %c0_2 = arith.constant 0 : index
    %1 = vector.load %arg2[%c0_1, %c0_2] : memref<4x128xf32, #tpu.memory_space<vmem>>, vector<4x128xf32>
    %cst = arith.constant dense<0.000000e+00> : vector<256x128xf32>
    %2 = tpu.matmul %0, %1, %cst {dimension_numbers = #tpu.dot_dimension_numbers<[1], [0], [0], [1], [0, 0, 1, 1], [], []>} : vector<256x4xf32>, vector<4x128xf32>, vector<256x128xf32> -> vector<256x128xf32>
    %c0_3 = arith.constant 0 : index
    %c0_4 = arith.constant 0 : index
    %3 = vector.load %arg3[%c0_3, %c0_4] : memref<1x128xf32, #tpu.memory_space<vmem>>, vector<1x128xf32>
    %4 = vector.broadcast %3 : vector<1x128xf32> to vector<256x128xf32>
    %5 = arith.addf %2, %4 : vector<256x128xf32>
    %c0_5 = arith.constant 0 : index
    %c0_6 = arith.constant 0 : index
    %6 = vector.load %arg4[%c0_5, %c0_6] : memref<256x128xf32, #tpu.memory_space<vmem>>, vector<256x128xf32>
    tpu.vector_store %arg4[%c0_5, %c0_6], %5 {strides = array<i32>} : memref<256x128xf32, #tpu.memory_space<vmem>>, vector<256x128xf32>,
    return
  }
  func.func @transform_0(%arg0: i32) -> (i32, i32) {
    %c0_i32 = arith.constant 0 : i32
    %c0_i32_0 = arith.constant 0 : i32
    return %arg0, %c0_i32 : i32, i32
  }
  func.func @transform_1(%arg0: i32) -> (i32, i32) {
    %c0_i32 = arith.constant 0 : i32
    %c0_i32_0 = arith.constant 0 : i32
    %c0_i32_1 = arith.constant 0 : i32
    return %c0_i32, %c0_i32_0 : i32, i32
  }
  func.func @transform_2(%arg0: i32) -> (i32, i32) {
    %c0_i32 = arith.constant 0 : i32
    %c0_i32_0 = arith.constant 0 : i32
    %c0_i32_1 = arith.constant 0 : i32
    return %c0_i32, %c0_i32_0 : i32, i32
  }
  func.func @transform_3(%arg0: i32) -> (i32, i32) {
    %c0_i32 = arith.constant 0 : i32
    %c0_i32_0 = arith.constant 0 : i32
    return %arg0, %c0_i32 : i32, i32
  }
}

</mosaic_0001>

<bundles_post_ra>
// kernel: tpu_custom_call.1
= control target key start
LH: loop header
LB: loop body
LE: loop exit
PB: predicated region body
PF: predicated region fallthrough
CT: control target
= control target key end

     0   :  { %8 = vsyncpa [#allocation3], 0  ;;  %s1153_s0 = inlined_call_operand.vmem [shape: f32[512,4], index: 0, kind: input, shape index: {}]   ;;  %s1154_s1 = inlined_call_operand.vmem [shape: f32[4,128], index: 1, kind: input, shape index: {}]   ;;  %s1155_s2 = inlined_call_operand.vmem [shape: f32[1,128], index: 2, kind: input, shape index: {}]   ;;  %s1156_s3 = inlined_call_operand.hbm [shape: f32[512,128], index: 3, kind: output, shape index: {}]  }
   0x1   :  { %10 = vsyncpa [#allocation3 + $0x1], 0  ;;  %s906_s12 = smov 0   ;;  %s908_s13 = smov 0  }
   0x2   :  { %s910_s14 = smov 0   ;;  %s912_s15 = smov 0  }
   0x3 LB: > { %s927_s16 = sadd.s32 4294967295, %s881_s15   ;;  %s646_s17 = sadd.s32 4294967294, %s881_s15   ;;  %s881_s15 = sphi %s912_s15, %s1162_s15   ;;  %s877_s14 = sphi %s910_s14, %s1161_s14   ;;  %s873_s13 = sphi %s908_s13, %s1160_s13   ;;  %s869_s12 = sphi %s906_s12, %s1159_s12  }
   0x4   : > { %s931_s18 = sadd.s32 1, %s881_s15   ;;  %s91_s19 = sadd.s32 1, %s877_s14 }
   0x5   : > { %s88_s20 = ssub.s32 %s881_s15, %s931_s18  ;;  %p101_p0 = scmp.ne.s32.totalorder %s877_s14, %s873_s13 }
   0x6   : > { %p89_p1 = scmp.eq.s32.totalorder %s88_s20, 0  ;;  %p102_p2 = scmp.eq.s32.totalorder %s927_s16, 1 }
   0x7   : > { %p107_p3 = scmp.ne.s32.totalorder %s873_s13, %s869_s12  ;;  %p108_p4 = scmp.eq.s32.totalorder %s646_s17, 1 }
   0x8   : > { %s942_s21 = scalar_select %p89_p1, %s877_s14, %s91_s19  }
   0x9   : > { %p944_p5 = por %p102_p2, %p101_p0  ;;  %p948_p6 = por %p108_p4, %p107_p3 }
   0xa   : > { %p649_p7 = scmp.ge.s32.totalorder %s881_s15, 1  ;;  %p141_p8 = scmp.lt.s32.totalorder %s881_s15, 3 }
   0xc   : > { %p142_p9 = pnand %p649_p7, %p141_p8 }
   0xd   : > { %v204_v0 = vld [vmem:[%s1154_s1] sm:$0xf] (!%p142_p9)  ;;  %vm309_vm0 = vcmask (!%p142_p9), 1043456   ;;  %s651_s26 = sshll.u32 (!%p142_p9), %s927_s16, 5  ;;  %vm212_vm1 = vcmask (!%p142_p9), 31744   ;;  %s162_s4 = sand.u32 (!%p142_p9), 1, %s873_s13  }
   0xe   : > { %145 = sbr.rel (%p142_p9) target bundleno = 285 (0x11d), region = 32  ;;  %726 = vmatprep.subr.msk.mxu0 (!%p142_p9), %vm309_vm0, %v204_v0  ;;  %776 = vmatprep.subr.msk.mxu1 (!%p142_p9), %vm309_vm0, %v204_v0  ;;  %p166_p10 = scmp.lt.s32.totalorder (!%p142_p9), %s651_s26, 63  ;;  %v1033_v33 = vld [vmem:[%s1155_s2] ss:$0 sm:$0xff] (!%p142_p9) }
   0xf   : > { %727 = vmatpush3.msk.msra.mxu0 (!%p142_p9), %vm309_vm0, %v204_v0  ;;  %777 = vmatpush3.msk.msra.mxu1 (!%p142_p9), %vm309_vm0, %v204_v0  ;;  %s650_s5 = sshll.u32 (!%p142_p9), %s162_s4, 8  ;;  %s692_s9 = sshll.u32 (!%p142_p9), %s927_s16, 12 }
  0x10   : > { %s1039_s8 = scalar_lea.vmem (!%p142_p9), [#allocation2], %s650_s5  ;;  %s1100_s17 = scalar_lea.hbm (!%p142_p9), %s1156_s3, %s692_s9 }
  0x11   : > { %s584_s10 = sshll.u32 (!%p142_p9), %s1039_s8, 4  ;;  %s1112_s19 = scalar_lea.sflag (!%p142_p9), [#allocation3], %s162_s4  ;;  %s1102_s10 = int_to_ptr.vmem [resolvable:$true] %s584_s10 }
  0x12   : > { %s819_s20 = scalar_lea.vmem (!%p142_p9), %s1102_s10, 4096  ;;  %s883_s24 = smov (!%p142_p9), [#allocation2]  }
  0x13   : > { %p820_p11 = scmp.ne.s32.totalorder (!%p142_p9), %s1102_s10, %s819_s20  ;;  %s823_s25 = sshll.u32 (!%p142_p9), %s883_s24, 4  ;;  %s824_s25 = int_to_ptr.vmem [resolvable:$false] %s823_s25 }
  0x14   : > { %p826_p0 = scmp.lt.s32.totalorder (!%p142_p9), %s1102_s10, %s824_s25 }
  0x15   : > { %s1164_s26 = smov (!%p166_p10, %s651_s26), 63  ;;  %p821_p12 = pnand %p820_p11, %p944_p5 }
  0x16   : > { %s652_s27 = sshll.u32 %s1164_s26, 3  ;;  %s825_s26 = scalar_lea.vmem %s824_s25, 8192 }
  0x17   : > { %s961_s30 = scalar_lea.vmem %s1153_s0, %s652_s27  ;;  %p822_p13 = pneg %p821_p12 }
  0x18   : > { %v172_v1 = vld [vmem:[%s961_s30] sm:$0xff]  ;;  %v173_v3 = vld [vmem:[%s961_s30 + $0x8] sm:$0xff]  ;;  %v174_v5 = vld [vmem:[%s961_s30 + $0x10] sm:$0xff]  ;;  %p827_p1 = scmp.lt.s32.totalorder %s825_s26, %s819_s20 }
  0x19   : > { %v188_v2 = vld [vmem:[%s961_s30 + $0x80] sm:$0xff]  ;;  %728 = vmatprep.mubr.msk.f32.mxu0 %vm212_vm1, %v172_v1  ;;  %v189_v4 = vld [vmem:[%s961_s30 + $0x88] sm:$0xff]  ;;  %v190_v6 = vld [vmem:[%s961_s30 + $0x90] sm:$0xff] }
  0x1a   : > { %752 = vmatprep.mubr.msk.f32.mxu1 %vm212_vm1, %v188_v2  ;;  %729 = vmatmul.mubr.msk.f32.vlgmr.msra.gmra.mrb[0].mxu0 %vm212_vm1, %v173_v3  ;;  %v175_v7 = vld [vmem:[%s961_s30 + $0x18] sm:$0xff]  ;;  %v176_v9 = vld [vmem:[%s961_s30 + $0x20] sm:$0xff]  ;;  %v177_v11 = vld [vmem:[%s961_s30 + $0x28] sm:$0xff]  ;;  %p828_p2 = por %p827_p1, %p826_p0 }
  0x1b   : > { %753 = vmatmul.mubr.msk.f32.vlgmr.msra.gmra.mrb[0].mxu1 %vm212_vm1, %v189_v4  ;;  %731 = vmatprep.mubr.msk.f32.mxu0 %vm212_vm1, %v174_v5  ;;  %v191_v8 = vld [vmem:[%s961_s30 + $0x98] sm:$0xff]  ;;  %v192_v10 = vld [vmem:[%s961_s30 + $0xa0] sm:$0xff]  ;;  %v193_v12 = vld [vmem:[%s961_s30 + $0xa8] sm:$0xff] }
  0x1c   : > { %755 = vmatprep.mubr.msk.f32.mxu1 %vm212_vm1, %v190_v6  ;;  %v178_v13 = vld [vmem:[%s961_s30 + $0x30] sm:$0xff]  ;;  %v179_v15 = vld [vmem:[%s961_s30 + $0x38] sm:$0xff]  ;;  %v180_v17 = vld [vmem:[%s961_s30 + $0x40] sm:$0xff]  ;;  %p829_p3 = pnand %p828_p2, %p822_p13 }
  0x1d   : > { %v194_v14 = vld [vmem:[%s961_s30 + $0xb0] sm:$0xff]  ;;  %v195_v16 = vld [vmem:[%s961_s30 + $0xb8] sm:$0xff]  ;;  %v196_v18 = vld [vmem:[%s961_s30 + $0xc0] sm:$0xff] }
  0x1e   : > { %732 = vmatmul.mubr.msk.f32.gmra.mrb[2].mxu0 %vm212_vm1, %v175_v7  ;;  %v181_v19 = vld [vmem:[%s961_s30 + $0x48] sm:$0xff]  ;;  %v182_v21 = vld [vmem:[%s961_s30 + $0x50] sm:$0xff]  ;;  %v183_v23 = vld [vmem:[%s961_s30 + $0x58] sm:$0xff] }
  0x1f   : > { %756 = vmatmul.mubr.msk.f32.gmra.mrb[2].mxu1 %vm212_vm1, %v191_v8  ;;  %734 = vmatprep.mubr.msk.f32.mxu0 %vm212_vm1, %v176_v9  ;;  %v197_v20 = vld [vmem:[%s961_s30 + $0xc8] sm:$0xff]  ;;  %v198_v22 = vld [vmem:[%s961_s30 + $0xd0] sm:$0xff]  ;;  %v199_v24 = vld [vmem:[%s961_s30 + $0xd8] sm:$0xff] }
  0x20   : > { %758 = vmatprep.mubr.msk.f32.mxu1 %vm212_vm1, %v192_v10  ;;  %v184_v25 = vld [vmem:[%s961_s30 + $0x60] sm:$0xff]  ;;  %v185_v27 = vld [vmem:[%s961_s30 + $0x68] sm:$0xff]  ;;  %v186_v29 = vld [vmem:[%s961_s30 + $0x70] sm:$0xff] }
  0x21   : > { %v200_v26 = vld [vmem:[%s961_s30 + $0xe0] sm:$0xff]  ;;  %v201_v28 = vld [vmem:[%s961_s30 + $0xe8] sm:$0xff]  ;;  %v202_v30 = vld [vmem:[%s961_s30 + $0xf0] sm:$0xff] }
  0x22   : > { %735 = vmatmul.mubr.msk.f32.gmra.mrb[4].mxu0 %vm212_vm1, %v177_v11  ;;  %v187_v31 = vld [vmem:[%s961_s30 + $0x78] sm:$0xff] }
  0x23   : > { %759 = vmatmul.mubr.msk.f32.gmra.mrb[4].mxu1 %vm212_vm1, %v193_v12  ;;  %737 = vmatprep.mubr.msk.f32.mxu0 %vm212_vm1, %v178_v13  ;;  %v203_v32 = vld [vmem:[%s961_s30 + $0xf8] sm:$0xff] }
  0x24   : > { %761 = vmatprep.mubr.msk.f32.mxu1 %vm212_vm1, %v194_v14 }
  0x26   : > { %738 = vmatmul.mubr.msk.f32.gmra.mrb[6].mxu0 %vm212_vm1, %v179_v15 }
  0x27   : > { %762 = vmatmul.mubr.msk.f32.gmra.mrb[6].mxu1 %vm212_vm1, %v195_v16  ;;  %740 = vmatprep.mubr.msk.f32.mxu0 %vm212_vm1, %v180_v17 }
  0x28   : > { %764 = vmatprep.mubr.msk.f32.mxu1 %vm212_vm1, %v196_v18 }
  0x2a   : > { %741 = vmatmul.mubr.msk.f32.gmra.mrb[8].mxu0 %vm212_vm1, %v181_v19 }
  0x2b   : > { %765 = vmatmul.mubr.msk.f32.gmra.mrb[8].mxu1 %vm212_vm1, %v197_v20  ;;  %743 = vmatprep.mubr.msk.f32.mxu0 %vm212_vm1, %v182_v21 }
  0x2c   : > { %767 = vmatprep.mubr.msk.f32.mxu1 %vm212_vm1, %v198_v22 }
  0x2e   : > { %744 = vmatmul.mubr.msk.f32.gmra.mrb[10].mxu0 %vm212_vm1, %v183_v23 }
  0x2f   : > { %768 = vmatmul.mubr.msk.f32.gmra.mrb[10].mxu1 %vm212_vm1, %v199_v24  ;;  %746 = vmatprep.mubr.msk.f32.mxu0 %vm212_vm1, %v184_v25 }
  0x30   : > { %770 = vmatprep.mubr.msk.f32.mxu1 %vm212_vm1, %v200_v26 }
  0x32   : > { %747 = vmatmul.mubr.msk.f32.gmra.mrb[12].mxu0 %vm212_vm1, %v185_v27 }
  0x33   : > { %771 = vmatmul.mubr.msk.f32.gmra.mrb[12].mxu1 %vm212_vm1, %v201_v28  ;;  %749 = vmatprep.mubr.msk.f32.mxu0 %vm212_vm1, %v186_v29 }
  0x34   : > { %773 = vmatprep.mubr.msk.f32.mxu1 %vm212_vm1, %v202_v30 }
  0x36   : > { %750 = vmatmul.mubr.msk.f32.gmra.mrb[14].mxu0 %vm212_vm1, %v187_v31 }
  0x37   : > { %774 = vmatmul.mubr.msk.f32.gmra.mrb[14].mxu1 %vm212_vm1, %v203_v32 }
  0xed   : > { %v730_v34 = vpop.f32.mrb[0].mxu0 }
  0xee   : > { %v754_v35 = vpop.f32.mrb[0].mxu1  ;;  %v385_v36 = vadd.f32 %v730_v34, %v1033_v33  ;;  %v379_v38 = vpop.f32.mrb[1].mxu0 }
  0xef   : > { %v465_v37 = vadd.f32 %v754_v35, %v1033_v33  ;;  %v459_v39 = vpop.f32.mrb[1].mxu1  ;;  %v380_v40 = vadd.f32 %v1033_v33, %v379_v38 }
  0xf0   : > { %v460_v41 = vadd.f32 %v1033_v33, %v459_v39  ;;  %539 = vst [vmem:[%s1039_s8 + $0x8] sm:$0xff] %v385_v36 }
  0xf1   : > { %555 = vst [vmem:[%s1039_s8 + $0x88] sm:$0xff] %v465_v37  ;;  %538 = vst [vmem:[%s1039_s8] sm:$0xff] %v380_v40  ;;  %v733_v42 = vpop.f32.mrb[2].mxu0 }
  0xf2   : > { %554 = vst [vmem:[%s1039_s8 + $0x80] sm:$0xff] %v460_v41  ;;  %v757_v43 = vpop.f32.mrb[2].mxu1  ;;  %v395_v44 = vadd.f32 %v733_v42, %v1033_v33  ;;  %v389_v46 = vpop.f32.mrb[3].mxu0 }
  0xf3   : > { %v475_v45 = vadd.f32 %v757_v43, %v1033_v33  ;;  %v469_v47 = vpop.f32.mrb[3].mxu1  ;;  %v390_v48 = vadd.f32 %v1033_v33, %v389_v46 }
  0xf4   : > { %v470_v49 = vadd.f32 %v1033_v33, %v469_v47  ;;  %541 = vst [vmem:[%s1039_s8 + $0x18] sm:$0xff] %v395_v44 }
  0xf5   : > { %557 = vst [vmem:[%s1039_s8 + $0x98] sm:$0xff] %v475_v45  ;;  %540 = vst [vmem:[%s1039_s8 + $0x10] sm:$0xff] %v390_v48  ;;  %v736_v50 = vpop.f32.mrb[4].mxu0 }
  0xf6   : > { %556 = vst [vmem:[%s1039_s8 + $0x90] sm:$0xff] %v470_v49  ;;  %v760_v51 = vpop.f32.mrb[4].mxu1  ;;  %v405_v52 = vadd.f32 %v736_v50, %v1033_v33  ;;  %v399_v54 = vpop.f32.mrb[5].mxu0 }
  0xf7   : > { %v485_v53 = vadd.f32 %v760_v51, %v1033_v33  ;;  %v479_v55 = vpop.f32.mrb[5].mxu1  ;;  %v400_v56 = vadd.f32 %v1033_v33, %v399_v54 }
  0xf8   : > { %v480_v57 = vadd.f32 %v1033_v33, %v479_v55  ;;  %543 = vst [vmem:[%s1039_s8 + $0x28] sm:$0xff] %v405_v52 }
  0xf9   : > { %559 = vst [vmem:[%s1039_s8 + $0xa8] sm:$0xff] %v485_v53  ;;  %542 = vst [vmem:[%s1039_s8 + $0x20] sm:$0xff] %v400_v56  ;;  %v739_v58 = vpop.f32.mrb[6].mxu0 }
  0xfa   : > { %558 = vst [vmem:[%s1039_s8 + $0xa0] sm:$0xff] %v480_v57  ;;  %v763_v59 = vpop.f32.mrb[6].mxu1  ;;  %v415_v60 = vadd.f32 %v739_v58, %v1033_v33  ;;  %v409_v62 = vpop.f32.mrb[7].mxu0 }
  0xfb   : > { %v495_v61 = vadd.f32 %v763_v59, %v1033_v33  ;;  %v489_v63 = vpop.f32.mrb[7].mxu1  ;;  %v410_v0 = vadd.f32 %v1033_v33, %v409_v62 }
  0xfc   : > { %v490_v1 = vadd.f32 %v1033_v33, %v489_v63  ;;  %545 = vst [vmem:[%s1039_s8 + $0x38] sm:$0xff] %v415_v60 }
  0xfd   : > { %561 = vst [vmem:[%s1039_s8 + $0xb8] sm:$0xff] %v495_v61  ;;  %544 = vst [vmem:[%s1039_s8 + $0x30] sm:$0xff] %v410_v0  ;;  %v742_v2 = vpop.f32.mrb[8].mxu0 }
  0xfe   : > { %560 = vst [vmem:[%s1039_s8 + $0xb0] sm:$0xff] %v490_v1  ;;  %v766_v3 = vpop.f32.mrb[8].mxu1  ;;  %v425_v4 = vadd.f32 %v742_v2, %v1033_v33  ;;  %v419_v6 = vpop.f32.mrb[9].mxu0 }
  0xff   : > { %v505_v5 = vadd.f32 %v766_v3, %v1033_v33  ;;  %v499_v7 = vpop.f32.mrb[9].mxu1  ;;  %v420_v8 = vadd.f32 %v1033_v33, %v419_v6 }
 0x100   : > { %v500_v9 = vadd.f32 %v1033_v33, %v499_v7  ;;  %547 = vst [vmem:[%s1039_s8 + $0x48] sm:$0xff] %v425_v4 }
 0x101   : > { %563 = vst [vmem:[%s1039_s8 + $0xc8] sm:$0xff] %v505_v5  ;;  %546 = vst [vmem:[%s1039_s8 + $0x40] sm:$0xff] %v420_v8  ;;  %v745_v10 = vpop.f32.mrb[10].mxu0 }
 0x102   : > { %562 = vst [vmem:[%s1039_s8 + $0xc0] sm:$0xff] %v500_v9  ;;  %v769_v11 = vpop.f32.mrb[10].mxu1  ;;  %v435_v12 = vadd.f32 %v745_v10, %v1033_v33  ;;  %v429_v14 = vpop.f32.mrb[11].mxu0 }
 0x103   : > { %v515_v13 = vadd.f32 %v769_v11, %v1033_v33  ;;  %v509_v15 = vpop.f32.mrb[11].mxu1  ;;  %v430_v16 = vadd.f32 %v1033_v33, %v429_v14 }
 0x104   : > { %v510_v17 = vadd.f32 %v1033_v33, %v509_v15  ;;  %549 = vst [vmem:[%s1039_s8 + $0x58] sm:$0xff] %v435_v12 }
 0x105   : > { %565 = vst [vmem:[%s1039_s8 + $0xd8] sm:$0xff] %v515_v13  ;;  %548 = vst [vmem:[%s1039_s8 + $0x50] sm:$0xff] %v430_v16  ;;  %v748_v18 = vpop.f32.mrb[12].mxu0 }
 0x106   : > { %564 = vst [vmem:[%s1039_s8 + $0xd0] sm:$0xff] %v510_v17  ;;  %v772_v19 = vpop.f32.mrb[12].mxu1  ;;  %v445_v20 = vadd.f32 %v748_v18, %v1033_v33  ;;  %v439_v22 = vpop.f32.mrb[13].mxu0 }
 0x107   : > { %v525_v21 = vadd.f32 %v772_v19, %v1033_v33  ;;  %v519_v23 = vpop.f32.mrb[13].mxu1  ;;  %v440_v24 = vadd.f32 %v1033_v33, %v439_v22 }
 0x108   : > { %v520_v25 = vadd.f32 %v1033_v33, %v519_v23  ;;  %551 = vst [vmem:[%s1039_s8 + $0x68] sm:$0xff] %v445_v20 }
 0x109   : > { %567 = vst [vmem:[%s1039_s8 + $0xe8] sm:$0xff] %v525_v21  ;;  %550 = vst [vmem:[%s1039_s8 + $0x60] sm:$0xff] %v440_v24  ;;  %v751_v26 = vpop.f32.mrb[14].mxu0 }
 0x10a   : > { %566 = vst [vmem:[%s1039_s8 + $0xe0] sm:$0xff] %v520_v25  ;;  %v775_v27 = vpop.f32.mrb[14].mxu1  ;;  %v455_v28 = vadd.f32 %v751_v26, %v1033_v33  ;;  %v449_v30 = vpop.f32.mrb[15].mxu0 }
 0x10b   : > { %v535_v29 = vadd.f32 %v775_v27, %v1033_v33  ;;  %v529_v31 = vpop.f32.mrb[15].mxu1  ;;  %v450_v32 = vadd.f32 %v1033_v33, %v449_v30 }
 0x10c   : > { %v530_v34 = vadd.f32 %v1033_v33, %v529_v31  ;;  %553 = vst [vmem:[%s1039_s8 + $0x78] sm:$0xff] %v455_v28 }
 0x10d   : > { %569 = vst [vmem:[%s1039_s8 + $0xf8] sm:$0xff] %v535_v29  ;;  %552 = vst [vmem:[%s1039_s8 + $0x70] sm:$0xff] %v450_v32 }
 0x10e   : > { %568 = vst [vmem:[%s1039_s8 + $0xf0] sm:$0xff] %v530_v34 }
 0x10f   : > { %832 = shalt.err (!%p829_p3)
}
 0x110   : > { %s833_s27 = scalar_lea.hbm %s1100_s17, 4096  ;;  %s837_s30 = scalar_lea.hbm %s1156_s3, 8192 }
 0x111   : > { %p834_p4 = scmp.ne.s32.totalorder %s1100_s17, %s833_s27  ;;  %p838_p9 = scmp.lt.u32.totalorder %s1100_s17, %s1156_s3 }
 0x112   : > { %p839_p10 = scmp.lt.u32.totalorder %s837_s30, %s833_s27  ;;  %p841_p12 = scmp.lt.u32.totalorder %s833_s27, %s1100_s17 }
 0x113   : > { %p835_p7 = pnand %p834_p4, %p944_p5 }
 0x114   : > { %p840_p11 = por %p839_p10, %p838_p9 }
 0x115   : > { %p836_p8 = pneg %p835_p7 }
 0x116   : > { %p842_p13 = por %p841_p12, %p840_p11 }
 0x118   : > { %p843_p0 = pnand %p842_p13, %p836_p8 }
 0x11a   : > { %846 = shalt.err (!%p843_p0)
}
 0x11b   : > { %s884_s6 = smov 128   ;;  %s885_s7 = smov 8  }
 0x11c   : > { %778 = dma.vmem_to_hbm [thread:$0]  (%p944_p5), %s1102_s10, 4096, %s1100_s17, %s1112_s19, %s884_s6, %s884_s6, %s885_s7  }
 0x11d PF: > { %p784_p1 = scmp.ge.s32.totalorder %s881_s15, 2  ;;  %s599_s8 = sand.u32 1, %s869_s12  }
 0x11e   : > { %s600_s9 = scalar_lea.sflag [#allocation3], %s599_s8 }
 0x11f   : > { %p781_p2 = pnand %p784_p1, %p948_p6 }
 0x121   : > { %864 = dma.done.wait (!%p781_p2), %s600_s9, 4096  }
 0x122   : > { %866 = vsyncadd (!%p781_p2), %s600_s9, 4294963200  ;;  %p13_p3 = scmp.ge.s32.totalorder %s931_s18, 4   ;;  %s1159_s12 = smov %s873_s13 }
 0x123   : > { %s1160_s13 = smov %s877_s14  ;;  %s1161_s14 = smov %s942_s21 }
 0x124   : > { %s1162_s15 = smov %s931_s18  ;;  %15 = sbr.rel (!%p13_p3) target bundleno = 3 (0x3), region = 67 }
 0x12b   :  { %605 = vsyncpa [#allocation3], 1 }
 0x12c   :  { %607 = vsyncpa [#allocation3 + $0x1], 1 }

</bundles_post_ra>
